<compile_context>
chip_gen: v5e
topology: v5e:2x2
jax: 0.10.0
libtpu: 0.0.40
codegen_flags: <defaults>
</compile_context>

<pallas_src>
import functools

import jax
import jax.numpy as jnp
from jax import lax
from jax.experimental import pallas as pl
from jax.experimental.pallas import tpu as pltpu


_VMEM_LIMIT_BYTES = 48 * 1024 * 1024  # < v7x 64 MiB physical, > v5e 16 MiB default


def _round_up(x, m):
    return ((x + m - 1) // m) * m


def _pick_tm(M, cap):
    """Pick an 8-aligned M tile <= cap, preferring one that divides M (no pad)."""
    Mp8 = _round_up(M, 8)
    tm = min(cap, Mp8)
    if Mp8 % tm == 0:
        return tm, Mp8
    # Look for a divisor of M that is still at least half the cap so we avoid
    # an extra HBM pad pass over the im2col matrix without shrinking tiles much.
    for c in range(tm, tm // 2 - 1, -8):
        if Mp8 % c == 0:
            return c, Mp8
    return tm, _round_up(Mp8, tm)


# ----------------------------------------------------------------------------
# Pallas kernels
# ----------------------------------------------------------------------------
def _gemm_bias_relu_kernel(p_ref, w_ref, b_ref, o_ref):
    """Single K-step: whole reduction in one MXU call, fused bias + ReLU."""
    y = jnp.dot(p_ref[...], w_ref[...], preferred_element_type=jnp.float32)
    y = y + b_ref[...]                       # bias broadcast over the M tile
    o_ref[...] = jnp.maximum(y, 0.0).astype(o_ref.dtype)


def _gemm_bias_relu_acc_kernel(p_ref, w_ref, b_ref, o_ref, acc_ref):
    """Fallback for large K: K-tiled reduction with an f32 VMEM accumulator."""
    k = pl.program_id(2)

    @pl.when(k == 0)
    def _():
        acc_ref[...] = jnp.zeros_like(acc_ref)

    acc_ref[...] += jnp.dot(p_ref[...], w_ref[...],
                            preferred_element_type=jnp.float32)

    @pl.when(k == pl.num_programs(2) - 1)
    def _():
        o_ref[...] = jnp.maximum(acc_ref[...] + b_ref[...], 0.0).astype(o_ref.dtype)


# ----------------------------------------------------------------------------
# GEMM driver
# ----------------------------------------------------------------------------
def conv_gemm_relu(patches, w_mat, b_row, *, tm_cap=1024, tn_cap=256,
                   tk=512, single_k_limit=2048):
    """relu(patches @ w_mat + b_row).

    patches: (M, Kp) with Kp % 128 == 0 (zero-padded tail columns already).
    w_mat:   (Kp, N).   b_row: (1, N) float32.   Returns (M, N) float32.
    """
    M, Kp = patches.shape
    Kp2, N = w_mat.shape
    assert Kp2 == Kp and Kp % 128 == 0 and b_row.shape == (1, N)

    # --- N tiling: lane-dense output; whole Cout per tile when it fits. ---
    tn = min(tn_cap, _round_up(N, 128))
    Np = _round_up(N, tn)
    if Np != N:
        w_mat = jnp.pad(w_mat, ((0, 0), (0, Np - N)))
        b_row = jnp.pad(b_row, ((0, 0), (0, Np - N)))

    # --- M tiling: big tiles, chosen to divide M so we don't re-pad HBM. ---
    tm, Mp = _pick_tm(M, tm_cap)
    if Mp != M:
        patches = jnp.pad(patches, ((0, Mp - M), (0, 0)))
    n_m, n_n = Mp // tm, Np // tn

    # Keep >= 2 parallel tiles so both v7x TensorCores get work.
    if n_m * n_n == 1 and tm >= 16 and (tm // 2) % 8 == 0 and Mp % (tm // 2) == 0:
        tm //= 2
        n_m = Mp // tm

    in_bytes = patches.dtype.itemsize
    cost = pl.CostEstimate(
        flops=2 * Mp * Np * Kp,
        transcendentals=0,
        bytes_accessed=in_bytes * (Mp * Kp + Kp * Np) + 4 * (Mp * Np + Np),
    )

    if Kp <= single_k_limit:
        # Common case: one K step -> no accumulator scratch, 2-D grid.
        # Grid order (M outer, N inner): patch tiles streamed exactly once;
        # weight/bias blocks only re-fetched when the N tile changes.
        out = pl.pallas_call(
            _gemm_bias_relu_kernel,
            out_shape=jax.ShapeDtypeStruct((Mp, Np), jnp.float32),
            grid_spec=pltpu.PrefetchScalarGridSpec(
                num_scalar_prefetch=0,
                grid=(n_m, n_n),
                in_specs=[
                    pl.BlockSpec((tm, Kp), lambda i, j: (i, 0)),   # patches
                    pl.BlockSpec((Kp, tn), lambda i, j: (0, j)),   # weights
                    pl.BlockSpec((1, tn), lambda i, j: (0, j)),    # bias row
                ],
                out_specs=pl.BlockSpec((tm, tn), lambda i, j: (i, j)),
            ),
            compiler_params=pltpu.CompilerParams(
                dimension_semantics=("parallel", "parallel"),
                vmem_limit_bytes=_VMEM_LIMIT_BYTES),
            cost_estimate=cost,
        )(patches, w_mat, b_row)
    else:
        # Rare large-K fallback: K-tiled reduction (K axis last, "arbitrary").
        tk = min(tk, Kp)
        Kpp = _round_up(Kp, tk)
        if Kpp != Kp:
            patches = jnp.pad(patches, ((0, 0), (0, Kpp - Kp)))
            w_mat = jnp.pad(w_mat, ((0, Kpp - Kp), (0, 0)))
        out = pl.pallas_call(
            _gemm_bias_relu_acc_kernel,
            out_shape=jax.ShapeDtypeStruct((Mp, Np), jnp.float32),
            grid_spec=pltpu.PrefetchScalarGridSpec(
                num_scalar_prefetch=0,
                grid=(n_m, n_n, Kpp // tk),
                in_specs=[
                    pl.BlockSpec((tm, tk), lambda i, j, kk: (i, kk)),
                    pl.BlockSpec((tk, tn), lambda i, j, kk: (kk, j)),
                    pl.BlockSpec((1, tn), lambda i, j, kk: (0, j)),
                ],
                out_specs=pl.BlockSpec((tm, tn), lambda i, j, kk: (i, j)),
                scratch_shapes=[pltpu.VMEM((tm, tn), jnp.float32)],
            ),
            compiler_params=pltpu.CompilerParams(
                dimension_semantics=("parallel", "parallel", "arbitrary"),
                vmem_limit_bytes=_VMEM_LIMIT_BYTES),
            cost_estimate=cost,
        )(patches, w_mat, b_row)

    return out[:M, :N]


# ----------------------------------------------------------------------------
# Glue (plain JAX): feature-last im2col with K-padding folded in, weight pack
# ----------------------------------------------------------------------------
def _im2col_nhwc(x_nhwc, k, stride, k_pad_to=128):
    """x: (B, H, W, C) -> (B*Ho*Wo, Kp); K order = (kh, kw, c), zero-padded to Kp."""
    B, H, W, C = x_nhwc.shape
    Ho = (H - k) // stride + 1
    Wo = (W - k) // stride + 1
    K = C * k * k
    Kp = _round_up(K, k_pad_to)
    taps = []
    for i in range(k):
        for j in range(k):
            taps.append(x_nhwc[:, i:i + stride * (Ho - 1) + 1:stride,
                               j:j + stride * (Wo - 1) + 1:stride, :])
    if Kp != K:
        taps.append(jnp.zeros((B, Ho, Wo, Kp - K), x_nhwc.dtype))
    p = jnp.concatenate(taps, axis=-1)          # (B, Ho, Wo, Kp) — one pass
    return p.reshape(B * Ho * Wo, Kp), Ho, Wo


@functools.partial(jax.jit, static_argnames=("kernel_size", "stride"))
def conv_layer_forward(x, weight, bias, kernel_size, stride=1):
    """ConvLayer.forward: relu(Conv2d(x)), VALID padding, stride 1.

    x: (B, Cin, H, W) NCHW.  weight: (Cout, Cin, k, k).  bias: (Cout,).
    Returns (B, Cout, Ho, Wo) NCHW float32, matching PyTorch.
    """
    B, Cin, H, W = x.shape
    Cout = weight.shape[0]
    k = kernel_size
    compute_dtype = jnp.bfloat16   # bf16 inputs, f32 MXU accumulation

    # NHWC bf16 activation (small relayout; halves all downstream HBM traffic).
    x_nhwc = jnp.transpose(x.astype(compute_dtype), (0, 2, 3, 1))
    patches, Ho, Wo = _im2col_nhwc(x_nhwc, k, stride, k_pad_to=128)  # (M, Kp)
    Kp = patches.shape[1]
    K = Cin * k * k

    # Weight reordered to the (kh, kw, c) patch order, K-padded to Kp (tiny).
    w_km = jnp.transpose(weight.astype(compute_dtype), (2, 3, 1, 0)).reshape(K, Cout)
    if Kp != K:
        w_km = jnp.pad(w_km, ((0, Kp - K), (0, 0)))
    b_row = bias.astype(jnp.float32).reshape(1, Cout)

    out = conv_gemm_relu(patches, w_km, b_row)   # (M, Cout) f32, lane-dense

    # Lane-dense (B, Ho, Wo, Cout) -> PyTorch NCHW.  (A channels-last consumer
    # could take `out.reshape(B, Ho, Wo, Cout)` directly and skip this pass.)
    return out.reshape(B, Ho, Wo, Cout).transpose(0, 3, 1, 2)


# ----------------------------------------------------------------------------
# Pure-JAX reference (correctness check only)
# ----------------------------------------------------------------------------
def conv_layer_reference(x, weight, bias, stride=1):
    y = lax.conv_general_dilated(
        x, weight, window_strides=(stride, stride), padding="VALID",
        dimension_numbers=("NCHW", "OIHW", "NCHW"))
    y = y + bias.reshape(1, -1, 1, 1)
    return jnp.maximum(y, 0.0)


if __name__ == "__main__":
    # Small, shape-consistent config (module defaults: Cin=1, Cout=256, k=9).
    B, Cin, H, W = 2, 4, 16, 16
    Cout, kernel_size, stride = 32, 9, 1

    key = jax.random.PRNGKey(0)
    kx, kw, kb = jax.random.split(key, 3)
    x = jax.random.normal(kx, (B, Cin, H, W), dtype=jnp.float32)
    weight = 0.1 * jax.random.normal(
        kw, (Cout, Cin, kernel_size, kernel_size), dtype=jnp.float32)
    bias = 0.1 * jax.random.normal(kb, (Cout,), dtype=jnp.float32)

    out = conv_layer_forward(x, weight, bias, kernel_size, stride)
    out = jax.block_until_ready(out)

    ref = conv_layer_reference(x, weight, bias, stride)
    assert out.shape == ref.shape, (out.shape, ref.shape)
    # bf16 kernel inputs vs f32 reference -> relaxed tolerance.
    err = float(jnp.max(jnp.abs(out - ref)))
    assert jnp.allclose(out, ref, atol=3e-2, rtol=3e-2), err

    print("KERNEL_OK")
</pallas_src>

<mosaic_0001>
module attributes {stable_mosaic.version = 11 : i64} {
  func.func @_gemm_bias_relu_kernel(%arg0: i32, %arg1: i32, %arg2: memref<64x384xbf16, #tpu.memory_space<vmem>>, %arg3: memref<384x128xbf16, #tpu.memory_space<vmem>>, %arg4: memref<1x128xf32, #tpu.memory_space<vmem>>, %arg5: memref<64x128xf32, #tpu.memory_space<vmem>>) attributes {dimension_semantics = [#tpu.dimension_semantics<parallel>, #tpu.dimension_semantics<parallel>], iteration_bounds = array<i64: 2, 1>, scalar_prefetch = 0 : i64, scratch_operands = 0 : i64, tpu.core_type = #tpu.core_type<tc>, window_params = [{transform_indices = @transform_0, window_bounds = array<i64: 64, 384>}, {transform_indices = @transform_1, window_bounds = array<i64: 384, 128>}, {transform_indices = @transform_2, window_bounds = array<i64: 1, 128>}, {transform_indices = @transform_3, window_bounds = array<i64: 64, 128>}]} {
    %c0 = arith.constant 0 : index
    %c0_0 = arith.constant 0 : index
    %0 = vector.load %arg2[%c0, %c0_0] : memref<64x384xbf16, #tpu.memory_space<vmem>>, vector<64x384xbf16>
    %c0_1 = arith.constant 0 : index
    %c0_2 = arith.constant 0 : index
    %1 = vector.load %arg3[%c0_1, %c0_2] : memref<384x128xbf16, #tpu.memory_space<vmem>>, vector<384x128xbf16>
    %cst = arith.constant dense<0.000000e+00> : vector<64x128xf32>
    %2 = tpu.matmul %0, %1, %cst {dimension_numbers = #tpu.dot_dimension_numbers<[1], [0], [0], [1], [0, 0, 1, 1], [], []>} : vector<64x384xbf16>, vector<384x128xbf16>, vector<64x128xf32> -> vector<64x128xf32>
    %c0_3 = arith.constant 0 : index
    %c0_4 = arith.constant 0 : index
    %3 = vector.load %arg4[%c0_3, %c0_4] : memref<1x128xf32, #tpu.memory_space<vmem>>, vector<1x128xf32>
    %4 = vector.broadcast %3 : vector<1x128xf32> to vector<64x128xf32>
    %5 = arith.addf %2, %4 : vector<64x128xf32>
    %cst_5 = arith.constant 0.000000e+00 : f32
    %6 = vector.broadcast %cst_5 : f32 to vector<64x128xf32>
    %7 = arith.maximumf %5, %6 : vector<64x128xf32>
    %c0_6 = arith.constant 0 : index
    %c0_7 = arith.constant 0 : index
    %8 = vector.load %arg5[%c0_6, %c0_7] : memref<64x128xf32, #tpu.memory_space<vmem>>, vector<64x128xf32>
    tpu.vector_store %arg5[%c0_6, %c0_7], %7 {strides = array<i32>} : memref<64x128xf32, #tpu.memory_space<vmem>>, vector<64x128xf32>,
    return
  }
  func.func @transform_0(%arg0: i32, %arg1: i32) -> (i32, i32) {
    %c0_i32 = arith.constant 0 : i32
    %c0_i32_0 = arith.constant 0 : i32
    return %arg0, %c0_i32 : i32, i32
  }
  func.func @transform_1(%arg0: i32, %arg1: i32) -> (i32, i32) {
    %c0_i32 = arith.constant 0 : i32
    %c0_i32_0 = arith.constant 0 : i32
    return %c0_i32, %arg1 : i32, i32
  }
  func.func @transform_2(%arg0: i32, %arg1: i32) -> (i32, i32) {
    %c0_i32 = arith.constant 0 : i32
    %c0_i32_0 = arith.constant 0 : i32
    return %c0_i32, %arg1 : i32, i32
  }
  func.func @transform_3(%arg0: i32, %arg1: i32) -> (i32, i32) {
    %c0_i32 = arith.constant 0 : i32
    return %arg0, %arg1 : i32, i32
  }
}

</mosaic_0001>

<bundles_post_ra>
// kernel: conv_layer_forward.1
= control target key start
LH: loop header
LB: loop body
LE: loop exit
PB: predicated region body
PF: predicated region fallthrough
CT: control target
= control target key end

     0   :  { %8 = vsyncpa [#allocation3], 0  ;;  %s1302_s0 = inlined_call_operand.vmem [shape: bf16[128,384], index: 0, kind: input, shape index: {}]   ;;  %s1303_s1 = inlined_call_operand.vmem [shape: bf16[384,128], index: 1, kind: input, shape index: {}]   ;;  %s1304_s2 = inlined_call_operand.vmem [shape: f32[1,128], index: 2, kind: input, shape index: {}]   ;;  %s1305_s3 = inlined_call_operand.hbm [shape: f32[128,128], index: 3, kind: output, shape index: {}]  }
   0x1   :  { %10 = vsyncpa [#allocation3 + $0x1], 0  ;;  %s1080_s12 = smov 0   ;;  %s1082_s13 = smov 0  }
   0x2   :  { %s1084_s14 = smov 0   ;;  %s1086_s15 = smov 0  }
   0x3   :  { %s1088_s16 = smov 0   ;;  %s1090_s17 = smov 0  }
   0x4 LB: > { %s715_s18 = sadd.s32 4294967295, %s1056_s17   ;;  %s716_s19 = sadd.s32 4294967294, %s1056_s17   ;;  %s1056_s17 = sphi %s1090_s17, %s16_s17   ;;  %s1052_s16 = sphi %s1088_s16, %s1312_s16   ;;  %s1048_s15 = sphi %s1086_s15, %s1311_s15   ;;  %s1044_s14 = sphi %s1084_s14, %s1310_s14   ;;  %s1040_s13 = sphi %s1082_s13, %s1309_s13   ;;  %s1036_s12 = sphi %s1080_s12, %s1308_s12  }
   0x5   : > { %s28_s20 = sadd.s32 1, %s1052_s16  ;;  %s115_s21 = sadd.s32 1, %s1044_s14 }
   0x6   : > { %p30_p0 = scmp.ge.s32.totalorder %s28_s20, 2  ;;  %p125_p1 = scmp.ne.s32.totalorder %s1044_s14, %s1040_s13 }
   0x7   : > { %p126_p2 = scmp.eq.s32.totalorder %s715_s18, 1  ;;  %p131_p3 = scmp.ne.s32.totalorder %s1040_s13, %s1036_s12 }
   0x8   : > { %s1314_s20 = smov (%p30_p0, %s28_s20), 0  ;;  %p132_p5 = scmp.eq.s32.totalorder %s716_s19, 1 }
   0x9   : > { %p1120_p4 = por %p126_p2, %p125_p1  ;;  %s110_s23 = ssub.s32 %s1052_s16, %s1314_s20 }
   0xa   : > { %p721_p6 = scmp.ge.s32.totalorder %s1056_s17, 1  ;;  %p113_p7 = scmp.eq.s32.totalorder %s110_s23, 0 }
   0xb   : > { %p1127_p8 = por %p132_p5, %p131_p3  ;;  %p173_p9 = scmp.lt.s32.totalorder %s1056_s17, 3 }
   0xc   : > { %s1133_s25 = scalar_select %p113_p7, %s1044_s14, %s115_s21  }
   0xd   : > { %p174_p10 = pnand %p721_p6, %p173_p9 }
   0xe   : > { %s723_s27 = sshll.u32 (!%p174_p10), %s1048_s15, 3  ;;  %s202_s4 = sand.u32 (!%p174_p10), 1, %s1040_s13  }
   0xf   : > { %177 = sbr.rel (%p174_p10) target bundleno = 250 (0xfa), region = 32  ;;  %p206_p11 = scmp.lt.s32.totalorder (!%p174_p10), %s723_s27, 15 }
  0x10   : > { %s722_s5 = sshll.u32 (!%p174_p10), %s202_s4, 6  ;;  %s910_s7 = sshll.u32 (!%p174_p10), %s1048_s15, 6 }
  0x11   : > { %s1247_s6 = scalar_lea.vmem (!%p174_p10), [#allocation2], %s722_s5  ;;  %s600_s15 = scalar_lea.sflag (!%p174_p10), [#allocation3], %s202_s4 }
  0x12   : > { %s613_s10 = sshll.u32 (!%p174_p10), %s1247_s6, 4  ;;  %s998_s26 = scalar_lea.hbm (!%p174_p10), %s1305_s3, 128  ;;  %s614_s10 = int_to_ptr.vmem [resolvable:$true] %s613_s10 }
  0x14   : > { %v893_v0 = vld [vmem:[%s1303_s1 + $0x38] sm:$0xff]  ;;  %v892_v3 = vld [vmem:[%s1303_s1 + $0x30] sm:$0xff]  ;;  %v891_v6 = vld [vmem:[%s1303_s1 + $0x28] sm:$0xff]  ;;  %s1316_s27 = smov (!%p206_p11, %s723_s27), 15 }
  0x15   : > { %v901_v1 = vld [vmem:[%s1303_s1 + $0x78] sm:$0xff]  ;;  %496 = vmatpush.bf16.msra.mxu0 %v893_v0  ;;  %v900_v4 = vld [vmem:[%s1303_s1 + $0x70] sm:$0xff]  ;;  %911 = vmatpush.bf16.msra.mxu3 %v893_v0  ;;  %v899_v7 = vld [vmem:[%s1303_s1 + $0x68] sm:$0xff]  ;;  %s919_s28 = smul.u32 12, %s1316_s27 }
  0x16   : > { %v909_v2 = vld [vmem:[%s1303_s1 + $0xb8] sm:$0xff]  ;;  %525 = vmatpush.bf16.msra.mxu1 %v901_v1  ;;  %v908_v5 = vld [vmem:[%s1303_s1 + $0xb0] sm:$0xff]  ;;  %v907_v8 = vld [vmem:[%s1303_s1 + $0xa8] sm:$0xff] }
  0x17   : > { %554 = vmatpush.bf16.msra.mxu2 %v909_v2  ;;  %v890_v9 = vld [vmem:[%s1303_s1 + $0x20] sm:$0xff]  ;;  %v889_v12 = vld [vmem:[%s1303_s1 + $0x18] sm:$0xff]  ;;  %v888_v15 = vld [vmem:[%s1303_s1 + $0x10] sm:$0xff]  ;;  %s1199_s27 = scalar_lea.vmem %s1302_s0, %s919_s28 }
  0x18   : > { %v898_v10 = vld [vmem:[%s1303_s1 + $0x60] sm:$0xff]  ;;  %v897_v13 = vld [vmem:[%s1303_s1 + $0x58] sm:$0xff]  ;;  %v896_v16 = vld [vmem:[%s1303_s1 + $0x50] sm:$0xff] }
  0x19   : > { %497 = vmatpush.bf16.msra.mxu0 %v892_v3  ;;  %912 = vmatpush.bf16.msra.mxu3 %v892_v3  ;;  %v906_v11 = vld [vmem:[%s1303_s1 + $0xa0] sm:$0xff]  ;;  %v905_v14 = vld [vmem:[%s1303_s1 + $0x98] sm:$0xff]  ;;  %v904_v17 = vld [vmem:[%s1303_s1 + $0x90] sm:$0xff] }
  0x1a   : > { %526 = vmatpush.bf16.msra.mxu1 %v900_v4  ;;  %v887_v18 = vld [vmem:[%s1303_s1 + $0x8] sm:$0xff]  ;;  %v886_v21 = vld [vmem:[%s1303_s1] sm:$0xff]  ;;  %v729_v27 = vld [vmem:[%s1199_s27 + $0xc] sm:$0xf0] }
  0x1b   : > { %555 = vmatpush.bf16.msra.mxu2 %v908_v5  ;;  %v895_v19 = vld [vmem:[%s1303_s1 + $0x48] sm:$0xff]  ;;  %v894_v22 = vld [vmem:[%s1303_s1 + $0x40] sm:$0xff]  ;;  %v876_v29 = vld [vmem:[%s1199_s27 + $0x10] sm:$0xf0] }
  0x1c   : > { %v903_v20 = vld [vmem:[%s1303_s1 + $0x88] sm:$0xff]  ;;  %v902_v23 = vld [vmem:[%s1303_s1 + $0x80] sm:$0xff]  ;;  %v739_v30 = vld [vmem:[%s1199_s27 + $0x18] sm:$0xf] }
  0x1d   : > { %498 = vmatpush.bf16.msra.mxu0 %v891_v6  ;;  %913 = vmatpush.bf16.msra.mxu3 %v891_v6  ;;  %v727_v24 = vld [vmem:[%s1199_s27] sm:$0xf]  ;;  %v875_v25 = vld [vmem:[%s1199_s27 + $0x8] sm:$0xf0]  ;;  %v874_v26 = vld [vmem:[%s1199_s27 + $0x4] sm:$0xf] }
  0x1e   : > { %527 = vmatpush.bf16.msra.mxu1 %v899_v7  ;;  %v735_v28 = vld [vmem:[%s1199_s27 + $0x8] sm:$0xf]  ;;  %v878_v31 = vld [vmem:[%s1199_s27 + $0x20] sm:$0xf0]  ;;  %v728_v32 = vor.u32 %v875_v25, %v727_v24  ;;  %v732_v33 = vor.u32 %v874_v26, %v729_v27  ;;  %v877_v36 = vld [vmem:[%s1199_s27 + $0x1c] sm:$0xf] }
  0x1f   : > { %556 = vmatpush.bf16.msra.mxu2 %v907_v8  ;;  %v736_v34 = vor.u32 %v876_v29, %v735_v28  ;;  %v740_v35 = vor.u32 %v878_v31, %v739_v30  ;;  %v741_v37 = vld [vmem:[%s1199_s27 + $0x24] sm:$0xf0]  ;;  %v747_v38 = vld [vmem:[%s1199_s27 + $0x20] sm:$0xf]  ;;  %v879_v39 = vld [vmem:[%s1199_s27 + $0x28] sm:$0xf0] }
  0x20   : > { %v751_v40 = vld [vmem:[%s1199_s27 + $0x30] sm:$0xf]  ;;  %v881_v41 = vld [vmem:[%s1199_s27 + $0x38] sm:$0xf0]  ;;  %v744_v42 = vor.u32 %v877_v36, %v741_v37  ;;  %v748_v43 = vor.u32 %v879_v39, %v747_v38  ;;  %v880_v45 = vld [vmem:[%s1199_s27 + $0x34] sm:$0xf] }
  0x21   : > { %499 = vmatpush.bf16.msra.mxu0 %v890_v9  ;;  %914 = vmatpush.bf16.msra.mxu3 %v890_v9  ;;  %v752_v44 = vor.u32 %v881_v41, %v751_v40  ;;  %v753_v46 = vld [vmem:[%s1199_s27 + $0x3c] sm:$0xf0]  ;;  %v759_v47 = vld [vmem:[%s1199_s27 + $0x38] sm:$0xf]  ;;  %v882_v48 = vld [vmem:[%s1199_s27 + $0x40] sm:$0xf0] }
  0x22   : > { %528 = vmatpush.bf16.msra.mxu1 %v898_v10  ;;  %v763_v49 = vld [vmem:[%s1199_s27 + $0x48] sm:$0xf]  ;;  %v884_v50 = vld [vmem:[%s1199_s27 + $0x50] sm:$0xf0]  ;;  %v756_v51 = vor.u32 %v880_v45, %v753_v46  ;;  %v760_v52 = vor.u32 %v882_v48, %v759_v47  ;;  %v883_v54 = vld [vmem:[%s1199_s27 + $0x4c] sm:$0xf] }
  0x23   : > { %557 = vmatpush.bf16.msra.mxu2 %v906_v11  ;;  %v764_v53 = vor.u32 %v884_v50, %v763_v49  ;;  %v765_v55 = vld [vmem:[%s1199_s27 + $0x54] sm:$0xf0]  ;;  %v771_v56 = vld [vmem:[%s1199_s27 + $0x50] sm:$0xf]  ;;  %v885_v57 = vld [vmem:[%s1199_s27 + $0x58] sm:$0xf0]  ;;  %s612_s27 = scalar_lea.hbm %s1305_s3, %s910_s7 }
  0x24   : > { %v768_v58 = vor.u32 %v883_v54, %v765_v55  ;;  %v772_v59 = vor.u32 %v885_v57, %v771_v56  ;;  %v1240_v60 = vld [vmem:[%s1304_s2] ss:$0 sm:$0xff]  ;;  %s615_s11 = sshll.u32 %s612_s27, 4  ;;  %s616_s11 = int_to_ptr.hbm [resolvable:$true] %s615_s11 }
  0x25   : > { %500 = vmatpush.bf16.msra.mxu0 %v889_v12  ;;  %915 = vmatpush.bf16.msra.mxu3 %v889_v12  ;;  %s992_s18 = sshra.s32 %s616_s11, 4  ;;  %s993_s18 = int_to_ptr.hbm [resolvable:$true] %s992_s18 }
  0x26   : > { %529 = vmatpush.bf16.msra.mxu1 %v897_v13  ;;  %s994_s19 = scalar_lea.hbm %s993_s18, 64  ;;  %p999_p1 = scmp.lt.s32.totalorder %s993_s18, %s1305_s3 }
  0x27   : > { %558 = vmatpush.bf16.msra.mxu2 %v905_v14  ;;  %p995_p12 = scmp.ne.s32.totalorder %s993_s18, %s994_s19  ;;  %p1000_p2 = scmp.lt.s32.totalorder %s998_s26, %s994_s19 }
  0x29   : > { %501 = vmatpush.bf16.msra.mxu0 %v888_v15  ;;  %916 = vmatpush.bf16.msra.mxu3 %v888_v15  ;;  %p996_p13 = pnand %p995_p12, %p1120_p4  ;;  %p1001_p3 = por %p1000_p2, %p999_p1 }
  0x2a   : > { %530 = vmatpush.bf16.msra.mxu1 %v896_v16 }
  0x2b   : > { %559 = vmatpush.bf16.msra.mxu2 %v904_v17  ;;  %p997_p0 = pneg %p996_p13 }
  0x2d   : > { %502 = vmatpush.bf16.msra.mxu0 %v887_v18  ;;  %917 = vmatpush.bf16.msra.mxu3 %v887_v18  ;;  %p1002_p5 = pnand %p1001_p3, %p997_p0 }
  0x2e   : > { %531 = vmatpush.bf16.msra.mxu1 %v895_v19 }
  0x2f   : > { %560 = vmatpush.bf16.msra.mxu2 %v903_v20 }
  0x31   : > { %503 = vmatpush.bf16.msra.mxu0 %v886_v21  ;;  %918 = vmatpush.bf16.msra.mxu3 %v886_v21 }
  0x32   : > { %532 = vmatpush.bf16.msra.mxu1 %v894_v22 }
  0x33   : > { %561 = vmatpush.bf16.msra.mxu2 %v902_v23 }
  0x34   : > { %504 = vmatmul.bf16.vlgmr.msra.gmra.mxu0 %v728_v32  ;;  %509 = vmatmul.bf16.vlgmr.msra.gmra.mxu3 %v740_v35 }
  0x35   : > { %533 = vmatmul.bf16.vlgmr.msra.gmra.mxu1 %v732_v33 }
  0x36   : > { %562 = vmatmul.bf16.vlgmr.msra.gmra.mxu2 %v736_v34 }
  0x44   : > { %514 = vmatmul.bf16.gmra.mxu3 %v752_v44 }
  0x45   : > { %538 = vmatmul.bf16.gmra.mxu1 %v744_v42 }
  0x46   : > { %567 = vmatmul.bf16.gmra.mxu2 %v748_v43 }
  0x54   : > { %519 = vmatmul.bf16.gmra.mxu3 %v764_v53 }
  0x55   : > { %543 = vmatmul.bf16.gmra.mxu1 %v756_v51 }
  0x56   : > { %572 = vmatmul.bf16.gmra.mxu2 %v760_v52 }
  0x65   : > { %548 = vmatmul.bf16.gmra.mxu1 %v768_v58 }
  0x66   : > { %577 = vmatmul.bf16.gmra.mxu2 %v772_v59 }
  0xb1   : > { %v505_v61 = vpop.f32.mrf.mxu0 }
  0xb2   : > { %v534_v62 = vpop.f32.mrf.mxu1  ;;  %v506_v63 = vadd.f32 %v1240_v60, %v505_v61 }
  0xb4   : > { %v535_v0 = vadd.f32 %v534_v62, %v506_v63 }
  0xb7   : > { %v510_v2 = vpop.f32.mrf.mxu3 }
  0xb8   : > { %v511_v10 = vadd.f32 %v1240_v60, %v510_v2 }
  0xb9   : > { %v563_v1 = vpop.f32.mrf.mxu2  ;;  %v507_v4 = vpop.f32.mrf.mxu0 }
  0xba   : > { %v564_v3 = vadd.f32 %v563_v1, %v535_v0  ;;  %v536_v5 = vpop.f32.mrf.mxu1  ;;  %v508_v7 = vadd.f32 %v1240_v60, %v507_v4 }
  0xbc   : > { %v583_v6 = vmax.f32 %v564_v3, 0.0  ;;  %v537_v8 = vadd.f32 %v536_v5, %v508_v7 }
  0xbe   : > { %591 = vst [vmem:[%s1247_s6] sm:$0xff] %v583_v6 }
  0xbf   : > { %v512_v13 = vpop.f32.mrf.mxu3 }
  0xc0   : > { %v513_v21 = vadd.f32 %v1240_v60, %v512_v13 }
  0xc1   : > { %v565_v9 = vpop.f32.mrf.mxu2 }
  0xc2   : > { %v566_v11 = vadd.f32 %v565_v9, %v537_v8  ;;  %v539_v12 = vpop.f32.mrf.mxu1 }
  0xc3   : > { %v540_v15 = vadd.f32 %v539_v12, %v511_v10 }
  0xc4   : > { %v584_v14 = vmax.f32 %v566_v11, 0.0 }
  0xc6   : > { %592 = vst [vmem:[%s1247_s6 + $0x8] sm:$0xff] %v584_v14 }
  0xc7   : > { %v515_v20 = vpop.f32.mrf.mxu3 }
  0xc8   : > { %v516_v24 = vadd.f32 %v1240_v60, %v515_v20 }
  0xc9   : > { %v568_v16 = vpop.f32.mrf.mxu2 }
  0xca   : > { %v569_v17 = vadd.f32 %v568_v16, %v540_v15  ;;  %v541_v18 = vpop.f32.mrf.mxu1 }
  0xcb   : > { %v542_v22 = vadd.f32 %v541_v18, %v513_v21 }
  0xcc   : > { %v585_v19 = vmax.f32 %v569_v17, 0.0 }
  0xce   : > { %593 = vst [vmem:[%s1247_s6 + $0x10] sm:$0xff] %v585_v19 }
  0xcf   : > { %v517_v29 = vpop.f32.mrf.mxu3 }
  0xd0   : > { %v518_v34 = vadd.f32 %v1240_v60, %v517_v29 }
  0xd1   : > { %v570_v23 = vpop.f32.mrf.mxu2 }
  0xd2   : > { %v571_v25 = vadd.f32 %v570_v23, %v542_v22  ;;  %v544_v26 = vpop.f32.mrf.mxu1 }
  0xd3   : > { %v545_v28 = vadd.f32 %v544_v26, %v516_v24 }
  0xd4   : > { %v586_v27 = vmax.f32 %v571_v25, 0.0 }
  0xd6   : > { %594 = vst [vmem:[%s1247_s6 + $0x18] sm:$0xff] %v586_v27 }
  0xd7   : > { %v520_v36 = vpop.f32.mrf.mxu3 }
  0xd8   : > { %v521_v38 = vadd.f32 %v1240_v60, %v520_v36 }
  0xd9   : > { %v573_v30 = vpop.f32.mrf.mxu2 }
  0xda   : > { %v574_v31 = vadd.f32 %v573_v30, %v545_v28  ;;  %v546_v32 = vpop.f32.mrf.mxu1 }
  0xdb   : > { %v547_v35 = vadd.f32 %v546_v32, %v518_v34 }
  0xdc   : > { %v587_v33 = vmax.f32 %v574_v31, 0.0 }
  0xde   : > { %595 = vst [vmem:[%s1247_s6 + $0x20] sm:$0xff] %v587_v33 }
  0xdf   : > { %v522_v45 = vpop.f32.mrf.mxu3 }
  0xe0   : > { %v523_v48 = vadd.f32 %v1240_v60, %v522_v45 }
  0xe1   : > { %v575_v37 = vpop.f32.mrf.mxu2 }
  0xe2   : > { %v576_v39 = vadd.f32 %v575_v37, %v547_v35  ;;  %v549_v40 = vpop.f32.mrf.mxu1 }
  0xe3   : > { %v550_v42 = vadd.f32 %v549_v40, %v521_v38 }
  0xe4   : > { %v588_v41 = vmax.f32 %v576_v39, 0.0 }
  0xe6   : > { %596 = vst [vmem:[%s1247_s6 + $0x28] sm:$0xff] %v588_v41 }
  0xe9   : > { %v578_v43 = vpop.f32.mrf.mxu2 }
  0xea   : > { %v579_v44 = vadd.f32 %v578_v43, %v550_v42  ;;  %v551_v47 = vpop.f32.mrf.mxu1 }
  0xeb   : > { %v552_v49 = vadd.f32 %v551_v47, %v523_v48 }
  0xec   : > { %v589_v46 = vmax.f32 %v579_v44, 0.0 }
  0xee   : > { %597 = vst [vmem:[%s1247_s6 + $0x30] sm:$0xff] %v589_v46 }
  0xf1   : > { %v580_v50 = vpop.f32.mrf.mxu2 }
  0xf2   : > { %v581_v51 = vadd.f32 %v580_v50, %v552_v49 }
  0xf4   : > { %v590_v52 = vmax.f32 %v581_v51, 0.0 }
  0xf6   : > { %598 = vst [vmem:[%s1247_s6 + $0x38] sm:$0xff] %v590_v52 }
  0xf7   : > { %1005 = shalt.err (!%p1002_p5)
}
  0xf8   : > { %s1058_s30 = smov 128   ;;  %s1059_s4 = smov 8  }
  0xf9   : > { %920 = dma.vmem_to_hbm [thread:$0]  (%p1120_p4), %s614_s10, 1024, %s616_s11, %s600_s15, %s1058_s30, %s1058_s30, %s1059_s4  }
  0xfa PF: > { %p926_p6 = scmp.ge.s32.totalorder %s1056_s17, 2  ;;  %s630_s5 = sand.u32 1, %s1036_s12  }
  0xfb   : > { %s631_s6 = scalar_lea.sflag [#allocation3], %s630_s5 }
  0xfc   : > { %p923_p7 = pnand %p926_p6, %p1127_p8 }
  0xfe   : > { %p924_p9 = pneg %p923_p7 }
 0x100   : > { %1031 = dma.done.wait (%p924_p9), %s631_s6, 1024  }
 0x101   : > { %1033 = vsyncadd (%p924_p9), %s631_s6, 4294966272  ;;  %s16_s17 = sadd.s32 1, %s1056_s17   ;;  %s1308_s12 = smov %s1040_s13 }
 0x102   : > { %p13_p10 = scmp.ge.s32.totalorder %s16_s17, 4   ;;  %s1309_s13 = smov %s1044_s14 }
 0x103   : > { %s1310_s14 = smov %s1133_s25  ;;  %s1311_s15 = smov %s1052_s16 }
 0x104   : > { %s1312_s16 = smov %s1314_s20  ;;  %15 = sbr.rel (!%p13_p10) target bundleno = 4 (0x4), region = 73 }
 0x109   :  { %637 = vsyncpa [#allocation3], 1 }
 0x10a   :  { %639 = vsyncpa [#allocation3 + $0x1], 1 }

</bundles_post_ra>
